<compile_context>
chip_gen: v6e
topology: v6e:2x2x1
jax: 0.10.0
libtpu: 0.0.40
codegen_flags: <defaults>
</compile_context>

<pallas_src>
import functools

import jax
import jax.numpy as jnp
from jax.experimental import pallas as pl
from jax.experimental.pallas import tpu as pltpu

BN_EPS = 1e-5


def _round_up(x, m):
    return (x + m - 1) // m * m


def _gen_block(x_f32, w_ref, vec_ref):
    """Linear (bias dropped: cancelled by BN) -> BatchNorm1d (batch stats) -> ReLU.

    vec_ref rows: [0]=gamma, [1]=beta, each (1, n_pad).
    Padded feature columns have zero weights and zero gamma/beta, so they stay
    exactly zero through BN + ReLU.
    """
    h = jnp.dot(
        x_f32.astype(jnp.bfloat16), w_ref[...], preferred_element_type=jnp.float32
    )
    mu = jnp.mean(h, axis=0, keepdims=True)
    # E[h^2] - mu^2, clamped >= 0 against cancellation before rsqrt.
    var = jnp.maximum(jnp.mean(h * h, axis=0, keepdims=True) - mu * mu, 0.0)
    scale = vec_ref[0:1, :] * jax.lax.rsqrt(var + BN_EPS)
    shift = vec_ref[1:2, :] - mu * scale
    return jnp.maximum(h * scale + shift, 0.0)


def generator_kernel(
    z_ref,
    w1_ref, v1_ref,
    w2_ref, v2_ref,
    w3_ref, v3_ref,
    w4_ref, v4_ref,
    w5_ref, b5_ref,
    out_ref,
):
    x = z_ref[...]                       # (mb, z_pad) f32, one micro-batch
    x = _gen_block(x, w1_ref, v1_ref)
    x = _gen_block(x, w2_ref, v2_ref)
    x = _gen_block(x, w3_ref, v3_ref)
    x = _gen_block(x, w4_ref, v4_ref)
    # Final Linear -> Sigmoid (lane-dense padded output, single tanh on EUP).
    y = jnp.dot(
        x.astype(jnp.bfloat16), w5_ref[...], preferred_element_type=jnp.float32
    ) + b5_ref[...]
    out_ref[...] = (0.5 * jnp.tanh(0.5 * y) + 0.5).astype(out_ref.dtype)


def init_params(key, z_dim, im_dim, hidden_dim):
    """Deterministic synthetic parameters matching the PyTorch module's shapes.

    Linear weights are stored already transposed: (in, out)."""
    dims = [
        (z_dim, hidden_dim),
        (hidden_dim, hidden_dim * 2),
        (hidden_dim * 2, hidden_dim * 4),
        (hidden_dim * 4, hidden_dim * 8),
    ]
    params = []
    for i, (din, dout) in enumerate(dims):
        kw, kb, kg, kbe = jax.random.split(jax.random.fold_in(key, i), 4)
        w = jax.random.normal(kw, (din, dout), jnp.float32) * (1.0 / jnp.sqrt(din))
        b = jax.random.normal(kb, (1, dout), jnp.float32) * 0.02
        gamma = 1.0 + 0.1 * jax.random.normal(kg, (1, dout), jnp.float32)
        beta = 0.1 * jax.random.normal(kbe, (1, dout), jnp.float32)
        params += [w, b, gamma, beta]
    kw5, kb5 = jax.random.split(jax.random.fold_in(key, 99), 2)
    din5 = hidden_dim * 8
    w5 = jax.random.normal(kw5, (din5, im_dim), jnp.float32) * (1.0 / jnp.sqrt(din5))
    b5 = jax.random.normal(kb5, (1, im_dim), jnp.float32) * 0.02
    params += [w5, b5]
    return params


def prepare_params(params, z_dim):
    """One-time packing (call once, reuse every forward):
      * weights zero-padded to lane-dense (128-multiple) K and N dims, cast bf16
      * (gamma, beta) stacked as (2, n_pad) f32, zero-padded (padding exact)
      * Linear bias inside BN blocks dropped (cancelled by BN mean subtraction)
      * final bias padded to (1, im_pad) f32.
    Returns (packed_list, im_dim)."""
    packed = []
    k_pad = _round_up(z_dim, 128)
    for i in range(4):
        w, _b, g, be = params[4 * i: 4 * i + 4]
        din, dout = w.shape
        n_pad = _round_up(dout, 128)
        w_p = (
            jnp.zeros((k_pad, n_pad), jnp.float32).at[:din, :dout].set(w)
        ).astype(jnp.bfloat16)
        vec = (
            jnp.zeros((2, n_pad), jnp.float32)
            .at[0, :dout].set(g[0])
            .at[1, :dout].set(be[0])
        )
        packed += [w_p, vec]
        k_pad = n_pad
    w5, b5 = params[-2:]
    din5, im_dim = w5.shape
    im_pad = _round_up(im_dim, 128)
    w5_p = (
        jnp.zeros((k_pad, im_pad), jnp.float32).at[:din5, :im_dim].set(w5)
    ).astype(jnp.bfloat16)
    b5_p = jnp.zeros((1, im_pad), jnp.float32).at[:, :im_dim].set(b5)
    packed += [w5_p, b5_p]
    return packed, im_dim


def generator_forward(noise, packed, im_dim):
    """noise: (G, mb, z_dim) or (mb, z_dim) f32; packed from prepare_params().

    Each micro-batch g gets its own BatchNorm statistics (== calling the
    PyTorch module G times)."""
    squeeze = noise.ndim == 2
    if squeeze:
        noise = noise[None]
    G, mb, z_dim = noise.shape

    z_pad = packed[0].shape[0]
    im_pad = packed[-1].shape[1]

    # Only the activations need per-call padding (cheap, batch-sized).
    noise_p = jnp.zeros((G, mb, z_pad), jnp.float32).at[:, :, :z_dim].set(noise)

    def const_spec(shape):
        return pl.BlockSpec(shape, lambda g: (0,) * len(shape))

    in_specs = [pl.BlockSpec((None, mb, z_pad), lambda g: (g, 0, 0))]
    in_specs += [const_spec(p.shape) for p in packed]
    out_specs = pl.BlockSpec((None, mb, im_pad), lambda g: (g, 0, 0))

    # VMEM budget: resident params + double-buffered noise/out + f32 temporaries.
    param_bytes = sum(int(p.size) * p.dtype.itemsize for p in packed)
    io_bytes = 2 * (mb * z_pad + mb * im_pad) * 4
    max_width = max(int(w.shape[1]) for w in packed[0::2])
    act_bytes = 6 * mb * max_width * 4
    vmem_bytes = min(
        max(param_bytes + io_bytes + act_bytes + (4 << 20), 32 << 20), 64 << 20
    )

    out = pl.pallas_call(
        generator_kernel,
        out_shape=jax.ShapeDtypeStruct((G, mb, im_pad), jnp.float32),
        grid=(G,),
        in_specs=in_specs,
        out_specs=out_specs,
        compiler_params=pltpu.CompilerParams(
            dimension_semantics=("parallel",),
            vmem_limit_bytes=vmem_bytes,
        ),
    )(noise_p, *packed)

    out = out[:, :, :im_dim]
    return out[0] if squeeze else out


def generator_reference(noise, params):
    """Pure-JAX reference mirroring PyTorch semantics (bias + (h-mu)^2 variance),
    same bf16-matmul / f32-accumulate policy. noise: (G, mb, z_dim)."""
    def one(x):
        for i in range(4):
            w, b, g, be = params[4 * i: 4 * i + 4]
            h = jnp.dot(
                x.astype(jnp.bfloat16), w.astype(jnp.bfloat16),
                preferred_element_type=jnp.float32,
            ) + b
            mu = jnp.mean(h, axis=0, keepdims=True)
            var = jnp.mean((h - mu) ** 2, axis=0, keepdims=True)
            x = jnp.maximum((h - mu) * jax.lax.rsqrt(var + BN_EPS) * g + be, 0.0)
        w5, b5 = params[-2:]
        y = jnp.dot(
            x.astype(jnp.bfloat16), w5.astype(jnp.bfloat16),
            preferred_element_type=jnp.float32,
        ) + b5
        return jax.nn.sigmoid(y)

    return jnp.stack([one(noise[g]) for g in range(noise.shape[0])])


if __name__ == "__main__":
    # Small shapes consistent with the module's defaults (scaled down).
    G, mb, z_dim, im_dim, hidden_dim = 2, 8, 10, 64, 32

    key = jax.random.PRNGKey(0)
    k_noise, k_params = jax.random.split(key)
    noise = jax.random.normal(k_noise, (G, mb, z_dim), jnp.float32)
    params = init_params(k_params, z_dim, im_dim, hidden_dim)

    # One-time packing (outside the per-call path).
    packed, im_dim_out = prepare_params(params, z_dim)

    fwd = jax.jit(functools.partial(generator_forward, im_dim=im_dim_out))
    out = jax.block_until_ready(fwd(noise, packed))

    ref = generator_reference(noise, params)
    assert out.shape == (G, mb, im_dim)
    assert bool(jnp.all(jnp.isfinite(out)))
    max_err = float(jnp.max(jnp.abs(out - ref)))
    assert max_err < 5e-3, f"mismatch vs reference: {max_err}"

    print("KERNEL_OK")
</pallas_src>

<mosaic_0001>
module attributes {stable_mosaic.version = 11 : i64} {
  func.func @generator_kernel(%arg0: i32, %arg1: memref<1x8x128xf32, #tpu.memory_space<vmem>>, %arg2: memref<128x128xbf16, #tpu.memory_space<vmem>>, %arg3: memref<2x128xf32, #tpu.memory_space<vmem>>, %arg4: memref<128x128xbf16, #tpu.memory_space<vmem>>, %arg5: memref<2x128xf32, #tpu.memory_space<vmem>>, %arg6: memref<128x128xbf16, #tpu.memory_space<vmem>>, %arg7: memref<2x128xf32, #tpu.memory_space<vmem>>, %arg8: memref<128x256xbf16, #tpu.memory_space<vmem>>, %arg9: memref<2x256xf32, #tpu.memory_space<vmem>>, %arg10: memref<256x128xbf16, #tpu.memory_space<vmem>>, %arg11: memref<1x128xf32, #tpu.memory_space<vmem>>, %arg12: memref<1x8x128xf32, #tpu.memory_space<vmem>>) attributes {dimension_semantics = [#tpu.dimension_semantics<parallel>], iteration_bounds = array<i64: 2>, scalar_prefetch = 0 : i64, scratch_operands = 0 : i64, tpu.core_type = #tpu.core_type<tc>, window_params = [{transform_indices = @transform_0, window_bounds = array<i64: 1, 8, 128>}, {pipeline_mode = #tpu.pipeline_mode<synchronous>, transform_indices = @transform_1, window_bounds = array<i64: 128, 128>}, {pipeline_mode = #tpu.pipeline_mode<synchronous>, transform_indices = @transform_2, window_bounds = array<i64: 2, 128>}, {pipeline_mode = #tpu.pipeline_mode<synchronous>, transform_indices = @transform_3, window_bounds = array<i64: 128, 128>}, {pipeline_mode = #tpu.pipeline_mode<synchronous>, transform_indices = @transform_4, window_bounds = array<i64: 2, 128>}, {pipeline_mode = #tpu.pipeline_mode<synchronous>, transform_indices = @transform_5, window_bounds = array<i64: 128, 128>}, {pipeline_mode = #tpu.pipeline_mode<synchronous>, transform_indices = @transform_6, window_bounds = array<i64: 2, 128>}, {pipeline_mode = #tpu.pipeline_mode<synchronous>, transform_indices = @transform_7, window_bounds = array<i64: 128, 256>}, {pipeline_mode = #tpu.pipeline_mode<synchronous>, transform_indices = @transform_8, window_bounds = array<i64: 2, 256>}, {pipeline_mode = #tpu.pipeline_mode<synchronous>, transform_indices = @transform_9, window_bounds = array<i64: 256, 128>}, {pipeline_mode = #tpu.pipeline_mode<synchronous>, transform_indices = @transform_10, window_bounds = array<i64: 1, 128>}, {transform_indices = @transform_11, window_bounds = array<i64: 1, 8, 128>}]} {
    %c0 = arith.constant 0 : index
    %c0_0 = arith.constant 0 : index
    %c0_1 = arith.constant 0 : index
    %0 = vector.load %arg1[%c0, %c0_0, %c0_1] : memref<1x8x128xf32, #tpu.memory_space<vmem>>, vector<1x8x128xf32>
    %1 = vector.shape_cast %0 : vector<1x8x128xf32> to vector<8x128xf32>
    %2 = arith.truncf %1 : vector<8x128xf32> to vector<8x128xbf16>
    %c0_2 = arith.constant 0 : index
    %c0_3 = arith.constant 0 : index
    %3 = vector.load %arg2[%c0_2, %c0_3] : memref<128x128xbf16, #tpu.memory_space<vmem>>, vector<128x128xbf16>
    %cst = arith.constant dense<0.000000e+00> : vector<8x128xf32>
    %4 = tpu.matmul %2, %3, %cst {dimension_numbers = #tpu.dot_dimension_numbers<[1], [0], [0], [1], [0, 0, 1, 1], [], []>} : vector<8x128xbf16>, vector<128x128xbf16>, vector<8x128xf32> -> vector<8x128xf32>
    %cst_4 = arith.constant dense<0.000000e+00> : vector<128xf32>
    %5 = vector.multi_reduction <add>, %4, %cst_4 [0] : vector<8x128xf32> to vector<128xf32>
    %6 = vector.shape_cast %5 : vector<128xf32> to vector<1x128xf32>
    %cst_5 = arith.constant 8.000000e+00 : f32
    %7 = vector.broadcast %cst_5 : f32 to vector<1x128xf32>
    %8 = arith.divf %6, %7 : vector<1x128xf32>
    %9 = arith.mulf %4, %4 : vector<8x128xf32>
    %cst_6 = arith.constant dense<0.000000e+00> : vector<128xf32>
    %10 = vector.multi_reduction <add>, %9, %cst_6 [0] : vector<8x128xf32> to vector<128xf32>
    %11 = vector.shape_cast %10 : vector<128xf32> to vector<1x128xf32>
    %cst_7 = arith.constant 8.000000e+00 : f32
    %12 = vector.broadcast %cst_7 : f32 to vector<1x128xf32>
    %13 = arith.divf %11, %12 : vector<1x128xf32>
    %14 = arith.mulf %8, %8 : vector<1x128xf32>
    %15 = arith.subf %13, %14 : vector<1x128xf32>
    %cst_8 = arith.constant 0.000000e+00 : f32
    %16 = vector.broadcast %cst_8 : f32 to vector<1x128xf32>
    %17 = arith.maximumf %15, %16 : vector<1x128xf32>
    %c0_9 = arith.constant 0 : index
    %c0_10 = arith.constant 0 : index
    %18 = vector.load %arg3[%c0_9, %c0_10] : memref<2x128xf32, #tpu.memory_space<vmem>>, vector<1x128xf32>
    %cst_11 = arith.constant 9.99999974E-6 : f32
    %19 = vector.broadcast %cst_11 : f32 to vector<1x128xf32>
    %20 = arith.addf %17, %19 : vector<1x128xf32>
    %21 = math.rsqrt %20 : vector<1x128xf32>
    %22 = arith.mulf %18, %21 : vector<1x128xf32>
    %c1 = arith.constant 1 : index
    %c0_12 = arith.constant 0 : index
    %23 = vector.load %arg3[%c1, %c0_12] : memref<2x128xf32, #tpu.memory_space<vmem>>, vector<1x128xf32>
    %24 = arith.mulf %8, %22 : vector<1x128xf32>
    %25 = arith.subf %23, %24 : vector<1x128xf32>
    %26 = vector.broadcast %22 : vector<1x128xf32> to vector<8x128xf32>
    %27 = arith.mulf %4, %26 : vector<8x128xf32>
    %28 = vector.broadcast %25 : vector<1x128xf32> to vector<8x128xf32>
    %29 = arith.addf %27, %28 : vector<8x128xf32>
    %cst_13 = arith.constant 0.000000e+00 : f32
    %30 = vector.broadcast %cst_13 : f32 to vector<8x128xf32>
    %31 = arith.maximumf %29, %30 : vector<8x128xf32>
    %32 = arith.truncf %31 : vector<8x128xf32> to vector<8x128xbf16>
    %c0_14 = arith.constant 0 : index
    %c0_15 = arith.constant 0 : index
    %33 = vector.load %arg4[%c0_14, %c0_15] : memref<128x128xbf16, #tpu.memory_space<vmem>>, vector<128x128xbf16>
    %cst_16 = arith.constant dense<0.000000e+00> : vector<8x128xf32>
    %34 = tpu.matmul %32, %33, %cst_16 {dimension_numbers = #tpu.dot_dimension_numbers<[1], [0], [0], [1], [0, 0, 1, 1], [], []>} : vector<8x128xbf16>, vector<128x128xbf16>, vector<8x128xf32> -> vector<8x128xf32>
    %cst_17 = arith.constant dense<0.000000e+00> : vector<128xf32>
    %35 = vector.multi_reduction <add>, %34, %cst_17 [0] : vector<8x128xf32> to vector<128xf32>
    %36 = vector.shape_cast %35 : vector<128xf32> to vector<1x128xf32>
    %cst_18 = arith.constant 8.000000e+00 : f32
    %37 = vector.broadcast %cst_18 : f32 to vector<1x128xf32>
    %38 = arith.divf %36, %37 : vector<1x128xf32>
    %39 = arith.mulf %34, %34 : vector<8x128xf32>
    %cst_19 = arith.constant dense<0.000000e+00> : vector<128xf32>
    %40 = vector.multi_reduction <add>, %39, %cst_19 [0] : vector<8x128xf32> to vector<128xf32>
    %41 = vector.shape_cast %40 : vector<128xf32> to vector<1x128xf32>
    %cst_20 = arith.constant 8.000000e+00 : f32
    %42 = vector.broadcast %cst_20 : f32 to vector<1x128xf32>
    %43 = arith.divf %41, %42 : vector<1x128xf32>
    %44 = arith.mulf %38, %38 : vector<1x128xf32>
    %45 = arith.subf %43, %44 : vector<1x128xf32>
    %cst_21 = arith.constant 0.000000e+00 : f32
    %46 = vector.broadcast %cst_21 : f32 to vector<1x128xf32>
    %47 = arith.maximumf %45, %46 : vector<1x128xf32>
    %c0_22 = arith.constant 0 : index
    %c0_23 = arith.constant 0 : index
    %48 = vector.load %arg5[%c0_22, %c0_23] : memref<2x128xf32, #tpu.memory_space<vmem>>, vector<1x128xf32>
    %cst_24 = arith.constant 9.99999974E-6 : f32
    %49 = vector.broadcast %cst_24 : f32 to vector<1x128xf32>
    %50 = arith.addf %47, %49 : vector<1x128xf32>
    %51 = math.rsqrt %50 : vector<1x128xf32>
    %52 = arith.mulf %48, %51 : vector<1x128xf32>
    %c1_25 = arith.constant 1 : index
    %c0_26 = arith.constant 0 : index
    %53 = vector.load %arg5[%c1_25, %c0_26] : memref<2x128xf32, #tpu.memory_space<vmem>>, vector<1x128xf32>
    %54 = arith.mulf %38, %52 : vector<1x128xf32>
    %55 = arith.subf %53, %54 : vector<1x128xf32>
    %56 = vector.broadcast %52 : vector<1x128xf32> to vector<8x128xf32>
    %57 = arith.mulf %34, %56 : vector<8x128xf32>
    %58 = vector.broadcast %55 : vector<1x128xf32> to vector<8x128xf32>
    %59 = arith.addf %57, %58 : vector<8x128xf32>
    %cst_27 = arith.constant 0.000000e+00 : f32
    %60 = vector.broadcast %cst_27 : f32 to vector<8x128xf32>
    %61 = arith.maximumf %59, %60 : vector<8x128xf32>
    %62 = arith.truncf %61 : vector<8x128xf32> to vector<8x128xbf16>
    %c0_28 = arith.constant 0 : index
    %c0_29 = arith.constant 0 : index
    %63 = vector.load %arg6[%c0_28, %c0_29] : memref<128x128xbf16, #tpu.memory_space<vmem>>, vector<128x128xbf16>
    %cst_30 = arith.constant dense<0.000000e+00> : vector<8x128xf32>
    %64 = tpu.matmul %62, %63, %cst_30 {dimension_numbers = #tpu.dot_dimension_numbers<[1], [0], [0], [1], [0, 0, 1, 1], [], []>} : vector<8x128xbf16>, vector<128x128xbf16>, vector<8x128xf32> -> vector<8x128xf32>
    %cst_31 = arith.constant dense<0.000000e+00> : vector<128xf32>
    %65 = vector.multi_reduction <add>, %64, %cst_31 [0] : vector<8x128xf32> to vector<128xf32>
    %66 = vector.shape_cast %65 : vector<128xf32> to vector<1x128xf32>
    %cst_32 = arith.constant 8.000000e+00 : f32
    %67 = vector.broadcast %cst_32 : f32 to vector<1x128xf32>
    %68 = arith.divf %66, %67 : vector<1x128xf32>
    %69 = arith.mulf %64, %64 : vector<8x128xf32>
    %cst_33 = arith.constant dense<0.000000e+00> : vector<128xf32>
    %70 = vector.multi_reduction <add>, %69, %cst_33 [0] : vector<8x128xf32> to vector<128xf32>
    %71 = vector.shape_cast %70 : vector<128xf32> to vector<1x128xf32>
    %cst_34 = arith.constant 8.000000e+00 : f32
    %72 = vector.broadcast %cst_34 : f32 to vector<1x128xf32>
    %73 = arith.divf %71, %72 : vector<1x128xf32>
    %74 = arith.mulf %68, %68 : vector<1x128xf32>
    %75 = arith.subf %73, %74 : vector<1x128xf32>
    %cst_35 = arith.constant 0.000000e+00 : f32
    %76 = vector.broadcast %cst_35 : f32 to vector<1x128xf32>
    %77 = arith.maximumf %75, %76 : vector<1x128xf32>
    %c0_36 = arith.constant 0 : index
    %c0_37 = arith.constant 0 : index
    %78 = vector.load %arg7[%c0_36, %c0_37] : memref<2x128xf32, #tpu.memory_space<vmem>>, vector<1x128xf32>
    %cst_38 = arith.constant 9.99999974E-6 : f32
    %79 = vector.broadcast %cst_38 : f32 to vector<1x128xf32>
    %80 = arith.addf %77, %79 : vector<1x128xf32>
    %81 = math.rsqrt %80 : vector<1x128xf32>
    %82 = arith.mulf %78, %81 : vector<1x128xf32>
    %c1_39 = arith.constant 1 : index
    %c0_40 = arith.constant 0 : index
    %83 = vector.load %arg7[%c1_39, %c0_40] : memref<2x128xf32, #tpu.memory_space<vmem>>, vector<1x128xf32>
    %84 = arith.mulf %68, %82 : vector<1x128xf32>
    %85 = arith.subf %83, %84 : vector<1x128xf32>
    %86 = vector.broadcast %82 : vector<1x128xf32> to vector<8x128xf32>
    %87 = arith.mulf %64, %86 : vector<8x128xf32>
    %88 = vector.broadcast %85 : vector<1x128xf32> to vector<8x128xf32>
    %89 = arith.addf %87, %88 : vector<8x128xf32>
    %cst_41 = arith.constant 0.000000e+00 : f32
    %90 = vector.broadcast %cst_41 : f32 to vector<8x128xf32>
    %91 = arith.maximumf %89, %90 : vector<8x128xf32>
    %92 = arith.truncf %91 : vector<8x128xf32> to vector<8x128xbf16>
    %c0_42 = arith.constant 0 : index
    %c0_43 = arith.constant 0 : index
    %93 = vector.load %arg8[%c0_42, %c0_43] : memref<128x256xbf16, #tpu.memory_space<vmem>>, vector<128x256xbf16>
    %cst_44 = arith.constant dense<0.000000e+00> : vector<8x256xf32>
    %94 = tpu.matmul %92, %93, %cst_44 {dimension_numbers = #tpu.dot_dimension_numbers<[1], [0], [0], [1], [0, 0, 1, 1], [], []>} : vector<8x128xbf16>, vector<128x256xbf16>, vector<8x256xf32> -> vector<8x256xf32>
    %cst_45 = arith.constant dense<0.000000e+00> : vector<256xf32>
    %95 = vector.multi_reduction <add>, %94, %cst_45 [0] : vector<8x256xf32> to vector<256xf32>
    %96 = vector.shape_cast %95 : vector<256xf32> to vector<1x256xf32>
    %cst_46 = arith.constant 8.000000e+00 : f32
    %97 = vector.broadcast %cst_46 : f32 to vector<1x256xf32>
    %98 = arith.divf %96, %97 : vector<1x256xf32>
    %99 = arith.mulf %94, %94 : vector<8x256xf32>
    %cst_47 = arith.constant dense<0.000000e+00> : vector<256xf32>
    %100 = vector.multi_reduction <add>, %99, %cst_47 [0] : vector<8x256xf32> to vector<256xf32>
    %101 = vector.shape_cast %100 : vector<256xf32> to vector<1x256xf32>
    %cst_48 = arith.constant 8.000000e+00 : f32
    %102 = vector.broadcast %cst_48 : f32 to vector<1x256xf32>
    %103 = arith.divf %101, %102 : vector<1x256xf32>
    %104 = arith.mulf %98, %98 : vector<1x256xf32>
    %105 = arith.subf %103, %104 : vector<1x256xf32>
    %cst_49 = arith.constant 0.000000e+00 : f32
    %106 = vector.broadcast %cst_49 : f32 to vector<1x256xf32>
    %107 = arith.maximumf %105, %106 : vector<1x256xf32>
    %c0_50 = arith.constant 0 : index
    %c0_51 = arith.constant 0 : index
    %108 = vector.load %arg9[%c0_50, %c0_51] : memref<2x256xf32, #tpu.memory_space<vmem>>, vector<1x256xf32>
    %cst_52 = arith.constant 9.99999974E-6 : f32
    %109 = vector.broadcast %cst_52 : f32 to vector<1x256xf32>
    %110 = arith.addf %107, %109 : vector<1x256xf32>
    %111 = math.rsqrt %110 : vector<1x256xf32>
    %112 = arith.mulf %108, %111 : vector<1x256xf32>
    %c1_53 = arith.constant 1 : index
    %c0_54 = arith.constant 0 : index
    %113 = vector.load %arg9[%c1_53, %c0_54] : memref<2x256xf32, #tpu.memory_space<vmem>>, vector<1x256xf32>
    %114 = arith.mulf %98, %112 : vector<1x256xf32>
    %115 = arith.subf %113, %114 : vector<1x256xf32>
    %116 = vector.broadcast %112 : vector<1x256xf32> to vector<8x256xf32>
    %117 = arith.mulf %94, %116 : vector<8x256xf32>
    %118 = vector.broadcast %115 : vector<1x256xf32> to vector<8x256xf32>
    %119 = arith.addf %117, %118 : vector<8x256xf32>
    %cst_55 = arith.constant 0.000000e+00 : f32
    %120 = vector.broadcast %cst_55 : f32 to vector<8x256xf32>
    %121 = arith.maximumf %119, %120 : vector<8x256xf32>
    %122 = arith.truncf %121 : vector<8x256xf32> to vector<8x256xbf16>
    %c0_56 = arith.constant 0 : index
    %c0_57 = arith.constant 0 : index
    %123 = vector.load %arg10[%c0_56, %c0_57] : memref<256x128xbf16, #tpu.memory_space<vmem>>, vector<256x128xbf16>
    %cst_58 = arith.constant dense<0.000000e+00> : vector<8x128xf32>
    %124 = tpu.matmul %122, %123, %cst_58 {dimension_numbers = #tpu.dot_dimension_numbers<[1], [0], [0], [1], [0, 0, 1, 1], [], []>} : vector<8x256xbf16>, vector<256x128xbf16>, vector<8x128xf32> -> vector<8x128xf32>
    %c0_59 = arith.constant 0 : index
    %c0_60 = arith.constant 0 : index
    %125 = vector.load %arg11[%c0_59, %c0_60] : memref<1x128xf32, #tpu.memory_space<vmem>>, vector<1x128xf32>
    %126 = vector.broadcast %125 : vector<1x128xf32> to vector<8x128xf32>
    %127 = arith.addf %124, %126 : vector<8x128xf32>
    %cst_61 = arith.constant 5.000000e-01 : f32
    %128 = vector.broadcast %cst_61 : f32 to vector<8x128xf32>
    %129 = arith.mulf %128, %127 : vector<8x128xf32>
    %130 = math.tanh %129 : vector<8x128xf32>
    %cst_62 = arith.constant 5.000000e-01 : f32
    %131 = vector.broadcast %cst_62 : f32 to vector<8x128xf32>
    %132 = arith.mulf %131, %130 : vector<8x128xf32>
    %cst_63 = arith.constant 5.000000e-01 : f32
    %133 = vector.broadcast %cst_63 : f32 to vector<8x128xf32>
    %134 = arith.addf %132, %133 : vector<8x128xf32>
    %c0_64 = arith.constant 0 : index
    %c0_65 = arith.constant 0 : index
    %c0_66 = arith.constant 0 : index
    %135 = vector.load %arg12[%c0_64, %c0_65, %c0_66] : memref<1x8x128xf32, #tpu.memory_space<vmem>>, vector<1x8x128xf32>
    %136 = vector.shape_cast %135 : vector<1x8x128xf32> to vector<8x128xf32>
    %137 = vector.shape_cast %134 : vector<8x128xf32> to vector<1x8x128xf32>
    tpu.vector_store %arg12[%c0_64, %c0_65, %c0_66], %137 {strides = array<i32>} : memref<1x8x128xf32, #tpu.memory_space<vmem>>, vector<1x8x128xf32>,
    return
  }
  func.func @transform_0(%arg0: i32) -> (i32, i32, i32) {
    %c0_i32 = arith.constant 0 : i32
    %c0_i32_0 = arith.constant 0 : i32
    %c0_i32_1 = arith.constant 0 : i32
    return %arg0, %c0_i32, %c0_i32_0 : i32, i32, i32
  }
  func.func @transform_1(%arg0: i32) -> (i32, i32) {
    %c0_i32 = arith.constant 0 : i32
    %c0_i32_0 = arith.constant 0 : i32
    %c0_i32_1 = arith.constant 0 : i32
    return %c0_i32, %c0_i32_0 : i32, i32
  }
  func.func @transform_2(%arg0: i32) -> (i32, i32) {
    %c0_i32 = arith.constant 0 : i32
    %c0_i32_0 = arith.constant 0 : i32
    %c0_i32_1 = arith.constant 0 : i32
    return %c0_i32, %c0_i32_0 : i32, i32
  }
  func.func @transform_3(%arg0: i32) -> (i32, i32) {
    %c0_i32 = arith.constant 0 : i32
    %c0_i32_0 = arith.constant 0 : i32
    %c0_i32_1 = arith.constant 0 : i32
    return %c0_i32, %c0_i32_0 : i32, i32
  }
  func.func @transform_4(%arg0: i32) -> (i32, i32) {
    %c0_i32 = arith.constant 0 : i32
    %c0_i32_0 = arith.constant 0 : i32
    %c0_i32_1 = arith.constant 0 : i32
    return %c0_i32, %c0_i32_0 : i32, i32
  }
  func.func @transform_5(%arg0: i32) -> (i32, i32) {
    %c0_i32 = arith.constant 0 : i32
    %c0_i32_0 = arith.constant 0 : i32
    %c0_i32_1 = arith.constant 0 : i32
    return %c0_i32, %c0_i32_0 : i32, i32
  }
  func.func @transform_6(%arg0: i32) -> (i32, i32) {
    %c0_i32 = arith.constant 0 : i32
    %c0_i32_0 = arith.constant 0 : i32
    %c0_i32_1 = arith.constant 0 : i32
    return %c0_i32, %c0_i32_0 : i32, i32
  }
  func.func @transform_7(%arg0: i32) -> (i32, i32) {
    %c0_i32 = arith.constant 0 : i32
    %c0_i32_0 = arith.constant 0 : i32
    %c0_i32_1 = arith.constant 0 : i32
    return %c0_i32, %c0_i32_0 : i32, i32
  }
  func.func @transform_8(%arg0: i32) -> (i32, i32) {
    %c0_i32 = arith.constant 0 : i32
    %c0_i32_0 = arith.constant 0 : i32
    %c0_i32_1 = arith.constant 0 : i32
    return %c0_i32, %c0_i32_0 : i32, i32
  }
  func.func @transform_9(%arg0: i32) -> (i32, i32) {
    %c0_i32 = arith.constant 0 : i32
    %c0_i32_0 = arith.constant 0 : i32
    %c0_i32_1 = arith.constant 0 : i32
    return %c0_i32, %c0_i32_0 : i32, i32
  }
  func.func @transform_10(%arg0: i32) -> (i32, i32) {
    %c0_i32 = arith.constant 0 : i32
    %c0_i32_0 = arith.constant 0 : i32
    %c0_i32_1 = arith.constant 0 : i32
    return %c0_i32, %c0_i32_0 : i32, i32
  }
  func.func @transform_11(%arg0: i32) -> (i32, i32, i32) {
    %c0_i32 = arith.constant 0 : i32
    %c0_i32_0 = arith.constant 0 : i32
    %c0_i32_1 = arith.constant 0 : i32
    return %arg0, %c0_i32, %c0_i32_0 : i32, i32, i32
  }
}

</mosaic_0001>

<bundles_post_ra>
// kernel: generator_forward.1
= control target key start
LH: loop header
LB: loop body
LE: loop exit
PB: predicated region body
PF: predicated region fallthrough
CT: control target
= control target key end

     0   :  { %16 = vsyncpa [#allocation3], 0  ;;  %s2320_s0 = inlined_call_operand.vmem [shape: f32[2,8,128], index: 0, kind: input, shape index: {}]   ;;  %s2321_s1 = inlined_call_operand.hbm [shape: bf16[128,128], index: 1, kind: input, shape index: {}]   ;;  %s2322_s2 = inlined_call_operand.vmem [shape: f32[2,128], index: 2, kind: input, shape index: {}]   ;;  %s2323_s3 = inlined_call_operand.hbm [shape: bf16[128,128], index: 3, kind: input, shape index: {}]   ;;  %s2324_s4 = inlined_call_operand.vmem [shape: f32[2,128], index: 4, kind: input, shape index: {}]   ;;  %s2325_s5 = inlined_call_operand.hbm [shape: bf16[128,128], index: 5, kind: input, shape index: {}]   ;;  %s2326_s6 = inlined_call_operand.vmem [shape: f32[2,128], index: 6, kind: input, shape index: {}]   ;;  %s2327_s7 = inlined_call_operand.hbm [shape: bf16[128,256], index: 7, kind: input, shape index: {}]   ;;  %s2328_s8 = inlined_call_operand.vmem [shape: f32[2,256], index: 8, kind: input, shape index: {}]   ;;  %s2329_s9 = inlined_call_operand.hbm [shape: bf16[256,128], index: 9, kind: input, shape index: {}]   ;;  %s2330_s10 = inlined_call_operand.vmem [shape: f32[1,128], index: 10, kind: input, shape index: {}]   ;;  %s2331_s11 = inlined_call_operand.hbm [shape: f32[2,8,128], index: 11, kind: output, shape index: {}]  }
   0x1   :  { %17 = vsyncpa [#allocation6], 0 }
   0x2   :  { %18 = vsyncpa [#allocation9], 0 }
   0x3   :  { %19 = vsyncpa [#allocation4], 0 }
   0x4   :  { %21 = vsyncpa [#allocation4 + $0x1], 0  ;;  %s2074_s17 = smov 0   ;;  %s2076_s18 = smov 0  }
   0x5   :  { %s2078_s19 = smov 0   ;;  %s2080_s20 = smov 0  }
   0x6 LB: > { %2341 = sst [smem:[#allocation16_spill]] %s1994_s19  ;;  %s2095_s21 = sadd.s32 4294967295, %s1998_s20   ;;  %s1998_s20 = sphi %s2080_s20, %s2360_s20   ;;  %s1994_s19 = sphi %s2078_s19, %s2362_s19   ;;  %s1990_s18 = sphi %s2076_s18, %s2364_s18   ;;  %s1986_s17 = sphi %s2074_s17, %s2363_s17  }
   0x7   : > { %s1435_s22 = sadd.s32 4294967294, %s1998_s20   ;;  %s2099_s23 = sadd.s32 1, %s1998_s20  }
   0x8   : > { %2342 = sst [smem:[#allocation17_spill]] %s2099_s23  ;;  %s270_s24 = sadd.s32 1, %s1994_s19 }
   0x9   : > { %s267_s25 = ssub.s32 %s1998_s20, %s2099_s23  ;;  %p280_p0 = scmp.ne.s32.totalorder %s1994_s19, %s1990_s18 }
   0xa   : > { %p268_p1 = scmp.eq.s32.totalorder %s267_s25, 0  ;;  %p281_p2 = scmp.eq.s32.totalorder %s2095_s21, 1 }
   0xb   : > { %p286_p3 = scmp.ne.s32.totalorder %s1990_s18, %s1986_s17  ;;  %p287_p4 = scmp.eq.s32.totalorder %s1435_s22, 1 }
   0xc   : > { %s2110_s26 = scalar_select %p268_p1, %s1994_s19, %s270_s24  }
   0xd   : > { %p2112_p5 = por %p281_p2, %p280_p0  ;;  %p2116_p6 = por %p287_p4, %p286_p3 }
   0xe   : > { %2343 = sst [smem:[#allocation18_spill]] %s2110_s26  ;;  %p1436_p7 = scmp.ge.s32.totalorder %s1998_s20, 1 }
   0xf   : > { %s2345_s28 = scalar_select %p2116_p6, 1, 0 }
  0x10   : > { %p294_p8 = scmp.lt.s32.totalorder %s1998_s20, 3  ;;  %p2340_p9 = scmp.eq.s32.totalorder %s2095_s21, 0 }
  0x11   : > { %2346 = sst [smem:[#allocation19_spill]] %s2345_s28  ;;  %s2000_s30 = smov [#allocation5]  }
  0x12   : > { %p2123_p10 = pnand %p1436_p7, %p294_p8  ;;  %s322_s12 = sshll.u32 %s2000_s30, 4  ;;  %s323_s12 = int_to_ptr.vmem [resolvable:$true] %s322_s12 }
  0x13   : > { %s2001_s14 = smov [#allocation8]   ;;  %s1807_s22 = scalar_lea.vmem %s323_s12, 1024 }
  0x14   : > { %p1644_p11 = pneg %p2123_p10  ;;  %s354_s15 = sshll.u32 %s2001_s14, 4  ;;  %s355_s15 = int_to_ptr.vmem [resolvable:$true] %s354_s15 }
  0x15   : > { %p1808_p0 = scmp.ne.s32.totalorder %s323_s12, %s1807_s22  ;;  %p1815_p3 = scmp.lt.s32.totalorder %s323_s12, %s323_s12 }
  0x16   : > { %p2131_p12 = pnand %p2340_p9, %p1644_p11  ;;  %p1816_p4 = scmp.lt.s32.totalorder %s1807_s22, %s1807_s22 }
  0x18   : > { %p2137_p13 = pneg %p2131_p12  ;;  %p1817_p7 = por %p1816_p4, %p1815_p3 }
  0x1a   : > { %p1810_p1 = pnand %p1808_p0, %p2137_p13 }
  0x1c   : > { %p1811_p2 = pneg %p1810_p1 }
  0x1e   : > { %p1818_p8 = pnand %p1817_p7, %p1811_p2 }
  0x20   : > { %1821 = shalt.err (!%p1818_p8)
}
  0x21   : > { %s2336_s24 = smov 64   ;;  %s2338_s25 = smov 4  }
  0x22   : > { %1650 = dma.hbm_to_vmem [thread:$0]  (!%p2131_p12), %s2323_s3, 1024, %s323_s12, [#allocation6], %s2336_s24, %s2336_s24, %s2338_s25  }
  0x23   : > { %s1833_s26 = scalar_lea.vmem %s355_s15, 2048  ;;  %p1841_p3 = scmp.lt.s32.totalorder %s355_s15, %s355_s15 }
  0x24   : > { %p1834_p11 = scmp.ne.s32.totalorder %s355_s15, %s1833_s26  ;;  %p1842_p2 = scmp.lt.s32.totalorder %s1833_s26, %s1833_s26 }
  0x26   : > { %p1836_p0 = pnand %p1834_p11, %p2137_p13  ;;  %p1843_p4 = por %p1842_p2, %p1841_p3 }
  0x28   : > { %p1837_p1 = pneg %p1836_p0 }
  0x2a   : > { %p1844_p7 = pnand %p1843_p4, %p1837_p1 }
  0x2c   : > { %1847 = shalt.err (!%p1844_p7)
}
  0x2d   : > { %s2004_s22 = smov 128   ;;  %s2005_s19 = smov 8  }
  0x2e   : > { %1656 = dma.hbm_to_vmem [thread:$0]  (!%p2131_p12), %s2327_s7, 2048, %s355_s15, [#allocation9], %s2004_s22, %s2004_s22, %s2005_s19  }
  0x2f   : > { %s2006_s12 = smov [#allocation2]   ;;  %s2007_s14 = smov [#allocation7]  }
  0x30   : > { %s306_s30 = sshll.u32 %s2006_s12, 4  ;;  %s338_s24 = sshll.u32 %s2007_s14, 4  ;;  %s307_s30 = int_to_ptr.vmem [resolvable:$true] %s306_s30  ;;  %s339_s24 = int_to_ptr.vmem [resolvable:$true] %s338_s24 }
  0x31   : > { %s1859_s25 = scalar_lea.vmem %s307_s30, 1024  ;;  %p1867_p1 = scmp.lt.s32.totalorder %s307_s30, %s307_s30 }
  0x32   : > { %p1860_p8 = scmp.ne.s32.totalorder %s307_s30, %s1859_s25  ;;  %p1868_p3 = scmp.lt.s32.totalorder %s1859_s25, %s1859_s25 }
  0x34   : > { %p1862_p11 = pnand %p1860_p8, %p2137_p13  ;;  %p1869_p2 = por %p1868_p3, %p1867_p1 }
  0x36   : > { %p1863_p0 = pneg %p1862_p11 }
  0x38   : > { %p1870_p4 = pnand %p1869_p2, %p1863_p0 }
  0x3a   : > { %1873 = shalt.err (!%p1870_p4)
}
  0x3b   : > { %s2350_s23 = smov 4   ;;  %s2351_s19 = smov 64  }
  0x3c   : > { %1647 = dma.hbm_to_vmem [thread:$0]  (!%p2131_p12), %s2321_s1, 1024, %s307_s30, [#allocation3], %s2351_s19, %s2351_s19, %s2350_s23  }
  0x3d   : > { %s1885_s15 = scalar_lea.vmem %s339_s24, 1024  ;;  %p1893_p9 = scmp.lt.s32.totalorder %s339_s24, %s339_s24 }
  0x3e   : > { %p1886_p7 = scmp.ne.s32.totalorder %s339_s24, %s1885_s15  ;;  %p1894_p6 = scmp.lt.s32.totalorder %s1885_s15, %s1885_s15 }
  0x40   : > { %p1888_p8 = pnand %p1886_p7, %p2137_p13  ;;  %p1895_p1 = por %p1894_p6, %p1893_p9 }
  0x42   : > { %p1889_p11 = pneg %p1888_p8 }
  0x44   : > { %p1896_p0 = pnand %p1895_p1, %p1889_p11 }
  0x46   : > { %1899 = shalt.err (!%p1896_p0)
}
  0x47   : > { %1653 = dma.hbm_to_vmem [thread:$0]  (!%p2131_p12), %s2325_s5, 1024, %s339_s24, [#allocation6], %s2351_s19, %s2351_s19, %s2350_s23  }
  0x48   : > { %s2008_s12 = smov [#allocation10]  }
  0x49   : > { %s370_s30 = sshll.u32 %s2008_s12, 4  ;;  %s371_s30 = int_to_ptr.vmem [resolvable:$true] %s370_s30 }
  0x4a   : > { %s1911_s14 = scalar_lea.vmem %s371_s30, 2048  ;;  %p1919_p9 = scmp.lt.s32.totalorder %s371_s30, %s371_s30 }
  0x4b   : > { %p1912_p3 = scmp.ne.s32.totalorder %s371_s30, %s1911_s14  ;;  %p1920_p4 = scmp.lt.s32.totalorder %s1911_s14, %s1911_s14 }
  0x4d   : > { %p1914_p2 = pnand %p1912_p3, %p2137_p13  ;;  %p1921_p7 = por %p1920_p4, %p1919_p9 }
  0x4f   : > { %p1915_p6 = pneg %p1914_p2 }
  0x51   : > { %p1922_p8 = pnand %p1921_p7, %p1915_p6 }
  0x53   : > { %1925 = shalt.err (!%p1922_p8)
}
  0x54   : > { %1659 = dma.hbm_to_vmem [thread:$0]  (!%p2131_p12), %s2329_s9, 2048, %s371_s30, [#allocation9], %s2351_s19, %s2351_s19, %s2350_s23  }
  0x55   : > { %396 = sbr.rel (%p2123_p10) target bundleno = 1354 (0x54a), region = 64  ;;  %p2352_p13 = scmp.eq.s32.totalorder (!%p2123_p10), %s2095_s21, 0 }
  0x5a   : > { %1969 = dma.done.wait (%p2352_p13), [#allocation3], 1024   ;;  %p2353_p11 = pmov %p2352_p13 }
  0x5c   : > { %1971 = vsyncadd (%p2353_p11), [#allocation3], 4294966272  ;;  %p2354_p1 = pmov %p2353_p11 }
  0x5e   : > { %1973 = dma.done.wait (%p2354_p1), [#allocation6], 2048   ;;  %p2355_p0 = pmov %p2354_p1 }
  0x60   : > { %1975 = vsyncadd (%p2355_p0), [#allocation6], 4294965248  ;;  %p2356_p3 = pmov %p2355_p0 }
  0x61   : > { %p2357_p12 = pmov %p2355_p0 }
  0x62   : > { %1977 = dma.done.wait (%p2356_p3), [#allocation9], 4096  }
  0x63   : > { %1979 = vsyncadd (%p2357_p12), [#allocation9], 4294963200  ;;  %v2009_v0 = vmov 0.0   ;;  %vm2010_vm0 = vmmov 0   ;;  %v1720_v1 = vld [vmem:[#allocation2 + $0x38] sm:$0xff]   ;;  %p451_p10 = scmp.lt.s32.totalorder %s2095_s21, 1  ;;  %v588_v42 = vlaneseq }
  0x64   : > { %1562 = vmatprep.subr.bf16.mxu0 %v2009_v0  ;;  %1578 = vmatprep.mubr.msk.bf16.mxu0 %vm2010_vm0, %v2009_v0  ;;  %v1721_v2 = vld [vmem:[#allocation2 + $0x30] sm:$0xff]   ;;  %v1722_v3 = vld [vmem:[#allocation2 + $0x28] sm:$0xff]   ;;  %v1723_v4 = vld [vmem:[#allocation2 + $0x20] sm:$0xff]   ;;  %s448_s12 = sand.u32 1, %s1990_s18   ;;  %s1510_s14 = sshll.u32 %s2095_s21, 7 }
  0x65   : > { %1582 = vmatprep.subr.bf16.mxu1 %v2009_v0  ;;  %1598 = vmatprep.mubr.msk.bf16.mxu1 %vm2010_vm0, %v2009_v0  ;;  %s452_s29 = scalar_select %p451_p10, %s2095_s21, 1  ;;  %v1724_v5 = vld [vmem:[#allocation2 + $0x18] sm:$0xff]   ;;  %v1725_v6 = vld [vmem:[#allocation2 + $0x10] sm:$0xff]   ;;  %v1726_v7 = vld [vmem:[#allocation2 + $0x8] sm:$0xff]   ;;  %v2230_v43 = vshrl.u32 %v588_v42, 7 }
  0x66   : > { %1563 = vmatpush3.bf16.msra.mxu0 %v1720_v1  ;;  %v1727_v8 = vld [vmem:[#allocation2] sm:$0xff]   ;;  %v1728_v11 = vld [vmem:[#allocation5 + $0x38] sm:$0xff]   ;;  %v1729_v12 = vld [vmem:[#allocation5 + $0x30] sm:$0xff]   ;;  %s1449_s30 = sshll.u32 %s448_s12, 3  ;;  %s1324_s16 = scalar_lea.hbm %s2331_s11, %s1510_s14 }
  0x67   : > { %1564 = vmatprep.subr.bf16.mxu0 %v2009_v0  ;;  %s1450_s13 = sshll.u32 %s452_s29, 3  ;;  %1583 = vmatpush3.bf16.msra.mxu1 %v1728_v11  ;;  %v1730_v13 = vld [vmem:[#allocation5 + $0x28] sm:$0xff]   ;;  %v1731_v14 = vld [vmem:[#allocation5 + $0x20] sm:$0xff]   ;;  %v1732_v15 = vld [vmem:[#allocation5 + $0x18] sm:$0xff]   ;;  %v2236_v45 = vsub.s32 0, %v2230_v43  ;;  %s450_s26 = scalar_lea.vmem [#allocation11], %s1449_s30 }
  0x68   : > { %s454_s19 = scalar_lea.vmem %s2320_s0, %s1450_s13  ;;  %1584 = vmatprep.subr.bf16.mxu1 %v2009_v0  ;;  %v1733_v16 = vld [vmem:[#allocation5 + $0x10] sm:$0xff]   ;;  %v1734_v17 = vld [vmem:[#allocation5 + $0x8] sm:$0xff]   ;;  %v1735_v18 = vld [vmem:[#allocation5] sm:$0xff]   ;;  %s1326_s24 = sshll.u32 %s450_s26, 4  ;;  %s1327_s24 = int_to_ptr.vmem [resolvable:$true] %s1326_s24 }
  0x69   : > { %v456_v9 = vld [vmem:[%s454_s19] sm:$0xff]  ;;  %v1736_v57 = vld [vmem:[#allocation7 + $0x38] sm:$0xff]   ;;  %v1737_v58 = vld [vmem:[#allocation7 + $0x30] sm:$0xff]   ;;  %s1313_s23 = scalar_lea.sflag [#allocation4], %s448_s12  ;;  %s1926_s19 = scalar_lea.vmem %s1327_s24, 128 }
  0x6a   : > { %1565 = vmatpush3.bf16.msra.mxu0 %v1721_v2  ;;  %v457_v10 = vpack.c.bf16 %v456_v9, %v456_v9  ;;  %v581_v44 = vld [vmem:[%s2322_s2] sm:$0x1]  ;;  %v585_v48 = vld [vmem:[%s2322_s2 + $0x1] sm:$0x1]  ;;  %v1738_v59 = vld [vmem:[#allocation7 + $0x28] sm:$0xff]   ;;  %p1927_p2 = scmp.ne.s32.totalorder %s1327_s24, %s1926_s19  ;;  %s2013_s28 = smov [#allocation11]  }
  0x6b   : > { %1566 = vmatprep.subr.bf16.mxu0 %v2009_v0  ;;  %1585 = vmatpush3.bf16.msra.mxu1 %v1729_v12  ;;  %v1739_v60 = vld [vmem:[#allocation7 + $0x20] sm:$0xff]   ;;  %v1740_v61 = vld [vmem:[#allocation7 + $0x18] sm:$0xff]   ;;  %v1741_v62 = vld [vmem:[#allocation7 + $0x10] sm:$0xff]   ;;  %s1930_s15 = sshll.u32 %s2013_s28, 4  ;;  %s1931_s15 = int_to_ptr.vmem [resolvable:$false] %s1930_s15 }
  0x6c   : > { %1586 = vmatprep.subr.bf16.mxu1 %v2009_v0  ;;  %v1742_v63 = vld [vmem:[#allocation7 + $0x8] sm:$0xff]   ;;  %v1743_v1 = vld [vmem:[#allocation7] sm:$0xff]   ;;  %p1928_p6 = pnand %p1927_p2, %p2112_p5  ;;  %s1932_s21 = scalar_lea.vmem %s1931_s15, 256 }
  0x6d   : > { %v1755_v42 = vld [vmem:[#allocation8 + $0x44] ss:$8 sps:$4 sm:$0xff]   ;;  %p1933_p4 = scmp.lt.s32.totalorder %s1327_s24, %s1931_s15  ;;  %p1934_p7 = scmp.lt.s32.totalorder %s1932_s21, %s1926_s19 }
  0x6e   : > { %1567 = vmatpush3.bf16.msra.mxu0 %v1722_v3  ;;  %p1929_p9 = pneg %p1928_p6 }
  0x6f   : > { %1568 = vmatprep.subr.bf16.mxu0 %v2009_v0  ;;  %1587 = vmatpush3.bf16.msra.mxu1 %v1730_v13  ;;  %p1935_p8 = por %p1934_p7, %p1933_p4 }
  0x70   : > { %1588 = vmatprep.subr.bf16.mxu1 %v2009_v0 }
  0x71   : > { %p1936_p13 = pnand %p1935_p8, %p1929_p9 }
  0x72   : > { %1569 = vmatpush3.bf16.msra.mxu0 %v1723_v4 }
  0x73   : > { %1570 = vmatprep.subr.bf16.mxu0 %v2009_v0  ;;  %1589 = vmatpush3.bf16.msra.mxu1 %v1731_v14 }
  0x74   : > { %1590 = vmatprep.subr.bf16.mxu1 %v2009_v0 }
  0x76   : > { %1571 = vmatpush3.bf16.msra.mxu0 %v1724_v5 }
  0x77   : > { %1572 = vmatprep.subr.bf16.mxu0 %v2009_v0  ;;  %1591 = vmatpush3.bf16.msra.mxu1 %v1732_v15 }
  0x78   : > { %1592 = vmatprep.subr.bf16.mxu1 %v2009_v0 }
  0x7a   : > { %1573 = vmatpush3.bf16.msra.mxu0 %v1725_v6 }
  0x7b   : > { %1574 = vmatprep.subr.bf16.mxu0 %v2009_v0  ;;  %1593 = vmatpush3.bf16.msra.mxu1 %v1733_v16 }
  0x7c   : > { %1594 = vmatprep.subr.bf16.mxu1 %v2009_v0 }
  0x7e   : > { %1575 = vmatpush3.bf16.msra.mxu0 %v1726_v7 }
  0x7f   : > { %1576 = vmatprep.subr.bf16.mxu0 %v2009_v0  ;;  %1595 = vmatpush3.bf16.msra.mxu1 %v1734_v17 }
  0x80   : > { %1596 = vmatprep.subr.bf16.mxu1 %v2009_v0 }
  0x82   : > { %1577 = vmatpush3.bf16.msra.mxu0 %v1727_v8 }
  0x83   : > { %1602 = vmatprep.subr.bf16.mxu0 %v2009_v0  ;;  %1597 = vmatpush3.bf16.msra.mxu1 %v1735_v18 }
  0x85   : > { %1579 = vmatmul.mubr.bf16.vlgmr.msra.gmra.mxu0 %v457_v10 }
  0x86   : > { %1618 = vmatprep.mubr.msk.bf16.mxu0 %vm2010_vm0, %v2009_v0  ;;  %1603 = vmatpush3.bf16.msra.mxu0 %v1736_v57 }
  0x87   : > { %1604 = vmatprep.subr.bf16.mxu0 %v2009_v0 }
  0x8a   : > { %1605 = vmatpush3.bf16.msra.mxu0 %v1737_v58 }
  0x8b   : > { %1606 = vmatprep.subr.bf16.mxu0 %v2009_v0 }
  0x8e   : > { %1607 = vmatpush3.bf16.msra.mxu0 %v1738_v59 }
  0x8f   : > { %1608 = vmatprep.subr.bf16.mxu0 %v2009_v0 }
  0x92   : > { %1609 = vmatpush3.bf16.msra.mxu0 %v1739_v60 }
  0x93   : > { %1610 = vmatprep.subr.bf16.mxu0 %v2009_v0 }
  0x96   : > { %1611 = vmatpush3.bf16.msra.mxu0 %v1740_v61 }
  0x97   : > { %1612 = vmatprep.subr.bf16.mxu0 %v2009_v0 }
  0x9a   : > { %1613 = vmatpush3.bf16.msra.mxu0 %v1741_v62 }
  0x9b   : > { %1614 = vmatprep.subr.bf16.mxu0 %v2009_v0 }
  0x9e   : > { %1615 = vmatpush3.bf16.msra.mxu0 %v1742_v63 }
  0x9f   : > { %1616 = vmatprep.subr.bf16.mxu0 %v2009_v0 }
  0xa2   : > { %1617 = vmatpush3.bf16.msra.mxu0 %v1743_v1 }
 0x145   : > { %v556_v19 = vpop.f32.mrf.mxu0 }
 0x146   : > { %v562_v20 = vrot.slane %v556_v19, 4  ;;  %v570_v21 = vmul.f32 %v556_v19, %v556_v19 }
 0x147   : > { %v1580_v22 = vpop.f32.mrf.mxu0 }
 0x148   : > { %v563_v23 = vadd.f32 %v562_v20, %v556_v19  ;;  %v571_v24 = vrot.slane %v570_v21, 4 }
 0x149   : > { %v559_v25 = vpop.f32.mrf.mxu0 }
 0x14a   : > { %v564_v26 = vrot.slane %v563_v23, 2  ;;  %v572_v27 = vadd.f32 %v571_v24, %v570_v21  ;;  %v722_v24 = vld [vmem:[%s2324_s4] sm:$0x1] }
 0x14b   : > { %v1581_v28 = vpop.f32.mrf.mxu0 }
 0x14c   : > { %v565_v29 = vadd.f32 %v564_v26, %v563_v23  ;;  %v573_v30 = vrot.slane %v572_v27, 2 }
 0x14e   : > { %v566_v31 = vrot.slane %v565_v29, 1  ;;  %v574_v32 = vadd.f32 %v573_v30, %v572_v27  ;;  %v726_v27 = vld [vmem:[%s2324_s4 + $0x1] sm:$0x1] }
 0x150   : > { %v567_v33 = vadd.f32 %v566_v31, %v565_v29  ;;  %v575_v34 = vrot.slane %v574_v32, 1 }
 0x152   : > { %v569_v35 = vmul.f32 0.125, %v567_v33  ;;  %v576_v36 = vadd.f32 %v575_v34, %v574_v32 }
 0x154   : > { %v577_v37 = vmul.f32 0.125, %v576_v36  ;;  %v578_v38 = vmul.f32 %v569_v35, %v569_v35  ;;  %v1746_v36 = vld [vmem:[#allocation8 + $0x74] ss:$8 sps:$4 sm:$0xff]  }
 0x155   : > { %978 = vmatprep.subr.bf16.mxu1 %v1746_v36  ;;  %v1778_v36 = vld [vmem:[#allocation10 + $0x50] sm:$0xff]  }
 0x156   : > { %v579_v39 = vsub.f32 %v577_v37, %v578_v38  ;;  %v1744_v37 = vld [vmem:[#allocation8 + $0x70] ss:$8 sps:$4 sm:$0xff]   ;;  %v1749_v38 = vld [vmem:[#allocation8 + $0x64] ss:$8 sps:$4 sm:$0xff]  }
 0x158   : > { %v580_v40 = vmax.f32 %v579_v39, 0.0  ;;  %v1747_v39 = vld [vmem:[#allocation8 + $0x60] ss:$8 sps:$4 sm:$0xff]  }
 0x15a   : > { %v582_v41 = vadd.f32 1e-05, %v580_v40  ;;  %v1752_v40 = vld [vmem:[#allocation8 + $0x54] ss:$8 sps:$4 sm:$0xff]  }
 0x15c   : > { %1784 = vrsqrt.f32 %v582_v41  ;;  %v1750_v41 = vld [vmem:[#allocation8 + $0x50] ss:$8 sps:$4 sm:$0xff]  }
 0x169   : > { %v1785_v46 = vpop.eup %1784 }
 0x16a   : > { %v584_v47 = vmul.f32 %v1785_v46, %v581_v44  ;;  %v1753_v44 = vld [vmem:[#allocation8 + $0x40] ss:$8 sps:$4 sm:$0xff]   ;;  %v1758_v46 = vld [vmem:[#allocation8 + $0x34] ss:$8 sps:$4 sm:$0xff]  }
 0x16c   : > { %v591_v49 = vrot.slane %v584_v47, %v2236_v45  ;;  %v586_v50 = vmul.f32 %v584_v47, %v569_v35  ;;  %v1756_v47 = vld [vmem:[#allocation8 + $0x30] ss:$8 sps:$4 sm:$0xff]  }
 0x16e   : > { %v587_v51 = vsub.f32 %v585_v48, %v586_v50  ;;  %v592_v52 = vmul.f32 %v591_v49, %v556_v19  ;;  %v1761_v48 = vld [vmem:[#allocation8 + $0x24] ss:$8 sps:$4 sm:$0xff]   ;;  %v1759_v49 = vld [vmem:[#allocation8 + $0x20] ss:$8 sps:$4 sm:$0xff]   ;;  %v1764_v50 = vld [vmem:[#allocation8 + $0x14] ss:$8 sps:$4 sm:$0xff]  }
 0x170   : > { %v596_v53 = vrot.slane %v587_v51, %v2236_v45  ;;  %v1762_v51 = vld [vmem:[#allocation8 + $0x10] ss:$8 sps:$4 sm:$0xff]  }
 0x172   : > { %v597_v54 = vadd.f32 %v596_v53, %v592_v52  ;;  %v1765_v52 = vld [vmem:[#allocation8] ss:$8 sps:$4 sm:$0xff]   ;;  %v1767_v53 = vld [vmem:[#allocation8 + $0x4] ss:$8 sps:$4 sm:$0xff]  }
 0x174   : > { %v598_v55 = vmax.f32 %v597_v54, 0.0  ;;  %v2011_v54 = vmov 0  }
 0x176   : > { %v599_v56 = vpack.c.bf16 %v598_v55, %v598_v55 }
 0x178   : > { %1599 = vmatmul.mubr.bf16.vlgmr.msra.gmra.mxu1 %v599_v56 }
 0x179   : > { %979 = vmatpush1.bf16.msra.mxu1 %v1744_v37  ;;  %1010 = vmatprep.mubr.bf16.mxu1 %v2011_v54  ;;  %v1779_v37 = vld [vmem:[#allocation10 + $0x10] sm:$0xff]  }
 0x17a   : > { %980 = vmatprep.subr.bf16.mxu1 %v1749_v38  ;;  %v1780_v38 = vld [vmem:[#allocation10 + $0x48] sm:$0xff]  }
 0x17d   : > { %981 = vmatpush1.bf16.msra.mxu1 %v1747_v39  ;;  %v1781_v39 = vld [vmem:[#allocation10 + $0x8] sm:$0xff]  }
 0x17e   : > { %982 = vmatprep.subr.bf16.mxu1 %v1752_v40  ;;  %v1782_v40 = vld [vmem:[#allocation10 + $0x40] sm:$0xff]  }
 0x181   : > { %983 = vmatpush1.bf16.msra.mxu1 %v1750_v41  ;;  %v1783_v41 = vld [vmem:[#allocation10] sm:$0xff]  }
 0x182   : > { %984 = vmatprep.subr.bf16.mxu1 %v1755_v42 }
 0x185   : > { %985 = vmatpush1.bf16.msra.mxu1 %v1753_v44 }
 0x186   : > { %986 = vmatprep.subr.bf16.mxu1 %v1758_v46 }
 0x189   : > { %987 = vmatpush1.bf16.msra.mxu1 %v1756_v47 }
 0x18a   : > { %988 = vmatprep.subr.bf16.mxu1 %v1761_v48 }
 0x18d   : > { %989 = vmatpush1.bf16.msra.mxu1 %v1759_v49 }
 0x18e   : > { %990 = vmatprep.subr.bf16.mxu1 %v1764_v50 }
 0x191   : > { %991 = vmatpush1.bf16.msra.mxu1 %v1762_v51 }
 0x192   : > { %992 = vmatprep.subr.bf16.mxu1 %v1767_v53 }
 0x195   : > { %993 = vmatpush1.bf16.msra.mxu1 %v1765_v52 }
 0x238   : > { %v698_v2 = vpop.f32.mrf.mxu1 }
 0x239   : > { %v704_v3 = vrot.slane %v698_v2, 4  ;;  %v711_v4 = vmul.f32 %v698_v2, %v698_v2 }
 0x23a   : > { %v1600_v5 = vpop.f32.mrf.mxu1 }
 0x23b   : > { %v705_v6 = vadd.f32 %v704_v3, %v698_v2  ;;  %v712_v7 = vrot.slane %v711_v4, 4 }
 0x23c   : > { %v701_v8 = vpop.f32.mrf.mxu1 }
 0x23d   : > { %v706_v9 = vrot.slane %v705_v6, 2  ;;  %v713_v10 = vadd.f32 %v712_v7, %v711_v4 }
 0x23e   : > { %v1601_v11 = vpop.f32.mrf.mxu1 }
 0x23f   : > { %v707_v12 = vadd.f32 %v706_v9, %v705_v6  ;;  %v714_v13 = vrot.slane %v713_v10, 2 }
 0x241   : > { %v708_v14 = vrot.slane %v707_v12, 1  ;;  %v715_v15 = vadd.f32 %v714_v13, %v713_v10 }
 0x243   : > { %v709_v16 = vadd.f32 %v708_v14, %v707_v12  ;;  %v716_v17 = vrot.slane %v715_v15, 1 }
 0x245   : > { %v710_v18 = vmul.f32 0.125, %v709_v16  ;;  %v717_v0 = vadd.f32 %v716_v17, %v715_v15  ;;  %v863_v15 = vld [vmem:[%s2326_s6] sm:$0x1] }
 0x247   : > { %v718_v19 = vmul.f32 0.125, %v717_v0  ;;  %v719_v20 = vmul.f32 %v710_v18, %v710_v18 }
 0x249   : > { %v720_v21 = vsub.f32 %v718_v19, %v719_v20 }
 0x24b   : > { %v721_v22 = vmax.f32 %v720_v21, 0.0 }
 0x24d   : > { %v723_v23 = vadd.f32 1e-05, %v721_v22 }
 0x24f   : > { %1786 = vrsqrt.f32 %v723_v23 }
 0x25c   : > { %v1787_v25 = vpop.eup %1786 }
 0x25d   : > { %v725_v26 = vmul.f32 %v1787_v25, %v722_v24 }
 0x25f   : > { %v727_v28 = vmul.f32 %v725_v26, %v710_v18  ;;  %v732_v29 = vrot.slane %v725_v26, %v2236_v45  ;;  %v867_v18 = vld [vmem:[%s2326_s6 + $0x1] sm:$0x1]  ;;  %v1768_v26 = vld [vmem:[#allocation10 + $0x78] sm:$0xff]  }
 0x260   : > { %1540 = vmatprep.subr.bf16.mxu0 %v1768_v26 }
 0x261   : > { %v728_v30 = vsub.f32 %v726_v27, %v727_v28  ;;  %v733_v31 = vmul.f32 %v732_v29, %v698_v2  ;;  %v1769_v27 = vld [vmem:[#allocation10 + $0x38] sm:$0xff]   ;;  %v1770_v28 = vld [vmem:[#allocation10 + $0x70] sm:$0xff]  }
 0x262   : > { %v1771_v29 = vld [vmem:[#allocation10 + $0x30] sm:$0xff]  }
 0x263   : > { %v737_v32 = vrot.slane %v728_v30, %v2236_v45  ;;  %v1772_v30 = vld [vmem:[#allocation10 + $0x68] sm:$0xff]  }
 0x265   : > { %v738_v33 = vadd.f32 %v737_v32, %v733_v31  ;;  %v1773_v31 = vld [vmem:[#allocation10 + $0x28] sm:$0xff]   ;;  %v1774_v32 = vld [vmem:[#allocation10 + $0x60] sm:$0xff]  }
 0x267   : > { %v739_v34 = vmax.f32 %v738_v33, 0.0  ;;  %v1775_v33 = vld [vmem:[#allocation10 + $0x20] sm:$0xff]  }
 0x269   : > { %v740_v35 = vpack.c.bf16 %v739_v34, %v739_v34  ;;  %v1776_v34 = vld [vmem:[#allocation10 + $0x58] sm:$0xff]  }
 0x26b   : > { %1619 = vmatmul.mubr.bf16.vlgmr.msra.gmra.mxu0 %v740_v35  ;;  %v1777_v35 = vld [vmem:[#allocation10 + $0x18] sm:$0xff]  }
 0x26c   : > { %1541 = vmatpush3.bf16.msra.mxu0 %v1769_v27 }
 0x26d   : > { %1542 = vmatprep.subr.bf16.mxu0 %v1770_v28 }
 0x270   : > { %1543 = vmatpush3.bf16.msra.mxu0 %v1771_v29 }
 0x271   : > { %1544 = vmatprep.subr.bf16.mxu0 %v1772_v30  ;;  %v1055_v30 = vld [vmem:[%s2328_s8] ss:$2 sm:$0x3] }
 0x274   : > { %1545 = vmatpush3.bf16.msra.mxu0 %v1773_v31 }
 0x275   : > { %1546 = vmatprep.subr.bf16.mxu0 %v1774_v32  ;;  %v1088_v32 = vsub.s32 1, %v2230_v43 }
 0x278   : > { %1547 = vmatpush3.bf16.msra.mxu0 %v1775_v33 }
 0x279   : > { %1548 = vmatprep.subr.bf16.mxu0 %v1776_v34 }
 0x27c   : > { %1549 = vmatpush3.bf16.msra.mxu0 %v1777_v35 }
 0x27d   : > { %1550 = vmatprep.subr.bf16.mxu0 %v1778_v36 }
 0x280   : > { %1551 = vmatpush3.bf16.msra.mxu0 %v1779_v37 }
 0x281   : > { %1552 = vmatprep.subr.bf16.mxu0 %v1780_v38 }
 0x284   : > { %1553 = vmatpush3.bf16.msra.mxu0 %v1781_v39 }
 0x285   : > { %1554 = vmatprep.subr.bf16.mxu0 %v1782_v40  ;;  %v1491_v40 = vld [vmem:[%s2328_s8 + $0x1] ss:$2 sm:$0x3] }
 0x288   : > { %1555 = vmatpush3.bf16.msra.mxu0 %v1783_v41 }
 0x32b   : > { %v839_v55 = vpop.f32.mrf.mxu0 }
 0x32c   : > { %v845_v56 = vrot.slane %v839_v55, 4  ;;  %v852_v57 = vmul.f32 %v839_v55, %v839_v55 }
 0x32d   : > { %v1620_v58 = vpop.f32.mrf.mxu0 }
 0x32e   : > { %v846_v59 = vadd.f32 %v845_v56, %v839_v55  ;;  %v853_v60 = vrot.slane %v852_v57, 4 }
 0x32f   : > { %v842_v61 = vpop.f32.mrf.mxu0 }
 0x330   : > { %v847_v62 = vrot.slane %v846_v59, 2  ;;  %v854_v63 = vadd.f32 %v853_v60, %v852_v57 }
 0x331   : > { %v1621_v1 = vpop.f32.mrf.mxu0 }
 0x332   : > { %v848_v2 = vadd.f32 %v847_v62, %v846_v59  ;;  %v855_v3 = vrot.slane %v854_v63, 2 }
 0x334   : > { %v849_v4 = vrot.slane %v848_v2, 1  ;;  %v856_v5 = vadd.f32 %v855_v3, %v854_v63 }
 0x336   : > { %v850_v6 = vadd.f32 %v849_v4, %v848_v2  ;;  %v857_v7 = vrot.slane %v856_v5, 1 }
 0x338   : > { %v851_v8 = vmul.f32 0.125, %v850_v6  ;;  %v858_v9 = vadd.f32 %v857_v7, %v856_v5 }
 0x33a   : > { %v859_v10 = vmul.f32 0.125, %v858_v9  ;;  %v860_v11 = vmul.f32 %v851_v8, %v851_v8 }
 0x33c   : > { %v861_v12 = vsub.f32 %v859_v10, %v860_v11 }
 0x33e   : > { %v862_v13 = vmax.f32 %v861_v12, 0.0 }
 0x340   : > { %v864_v14 = vadd.f32 1e-05, %v862_v13 }
 0x342   : > { %1788 = vrsqrt.f32 %v864_v14 }
 0x34f   : > { %v1789_v16 = vpop.eup %1788 }
 0x350   : > { %v866_v17 = vmul.f32 %v1789_v16, %v863_v15 }
 0x352   : > { %v868_v0 = vmul.f32 %v866_v17, %v851_v8  ;;  %v873_v19 = vrot.slane %v866_v17, %v2236_v45 }
 0x354   : > { %v869_v20 = vsub.f32 %v867_v18, %v868_v0  ;;  %v874_v21 = vmul.f32 %v873_v19, %v839_v55 }
 0x356   : > { %v878_v22 = vrot.slane %v869_v20, %v2236_v45 }
 0x358   : > { %v879_v23 = vadd.f32 %v878_v22, %v874_v21  ;;  %v2012_v22 = vmov 1966171168  }
 0x35a   : > { %v880_v24 = vmax.f32 %v879_v23, 0.0  ;;  %v1064_v23 = vunpack.c.l.s4 %v2012_v22 }
 0x35c   : > { %v881_v25 = vpack.c.bf16 %v880_v24, %v880_v24  ;;  %v1065_v24 = vunpack.c.0.s8 %v1064_v23 }
 0x35e   : > { %1011 = vmatmul.mubr.bf16.vlgmr.msra.gmra.mxu1 %v881_v25  ;;  %v1068_v26 = vsub.s32 %v1065_v24, %v2230_v43 }
 0x41e   : > { %v2266_v42 = vpop.f32.mrf.mxu1 }
 0x41f   : > { %v1019_v44 = vrot.slane %v2266_v42, 4  ;;  %v1033_v46 = vmul.f32 %v2266_v42, %v2266_v42 }
 0x420   : > { %v1014_v47 = vpop.f32.mrf.mxu1 }
 0x421   : > { %v1020_v48 = vadd.f32 %v1019_v44, %v2266_v42  ;;  %v1035_v49 = vrot.slane %v1033_v46, 4  ;;  %v1025_v50 = vrot.slane %v1014_v47, 4  ;;  %v1034_v51 = vmul.f32 %v1014_v47, %v1014_v47 }
 0x422   : > { %v1016_v52 = vpop.f32.mrf.mxu1 }
 0x423   : > { %v1021_v53 = vrot.slane %v1020_v48, 2  ;;  %v1036_v54 = vadd.f32 %v1035_v49, %v1033_v46  ;;  %v1026_v55 = vadd.f32 %v1025_v50, %v1014_v47  ;;  %v1041_v56 = vrot.slane %v1034_v51, 4 }
 0x424   : > { %v1017_v57 = vpop.f32.mrf.mxu1 }
 0x425   : > { %v1022_v58 = vadd.f32 %v1021_v53, %v1020_v48  ;;  %v1037_v59 = vrot.slane %v1036_v54, 2  ;;  %v1027_v60 = vrot.slane %v1026_v55, 2  ;;  %v1042_v61 = vadd.f32 %v1041_v56, %v1034_v51 }
 0x427   : > { %v1023_v62 = vrot.slane %v1022_v58, 1  ;;  %v1038_v63 = vadd.f32 %v1037_v59, %v1036_v54  ;;  %v1028_v1 = vadd.f32 %v1027_v60, %v1026_v55  ;;  %v1043_v2 = vrot.slane %v1042_v61, 2 }
 0x429   : > { %v1024_v3 = vadd.f32 %v1023_v62, %v1022_v58  ;;  %v1039_v4 = vrot.slane %v1038_v63, 1  ;;  %v1029_v5 = vrot.slane %v1028_v1, 1  ;;  %v1044_v6 = vadd.f32 %v1043_v2, %v1042_v61 }
 0x42b   : > { %v1031_v7 = vmul.f32 0.125, %v1024_v3  ;;  %v1040_v8 = vadd.f32 %v1039_v4, %v1038_v63  ;;  %v1030_v9 = vadd.f32 %v1029_v5, %v1028_v1  ;;  %v1045_v10 = vrot.slane %v1044_v6, 1 }
 0x42d   : > { %v1047_v11 = vmul.f32 0.125, %v1040_v8  ;;  %v1049_v12 = vmul.f32 %v1031_v7, %v1031_v7  ;;  %v1032_v13 = vmul.f32 0.125, %v1030_v9  ;;  %v1046_v14 = vadd.f32 %v1045_v10, %v1044_v6 }
 0x42f   : > { %v1051_v15 = vsub.f32 %v1047_v11, %v1049_v12  ;;  %v1048_v16 = vmul.f32 0.125, %v1046_v14  ;;  %v1050_v17 = vmul.f32 %v1032_v13, %v1032_v13 }
 0x431   : > { %v1053_v18 = vmax.f32 %v1051_v15, 0.0  ;;  %v1052_v0 = vsub.f32 %v1048_v16, %v1050_v17 }
 0x433   : > { %v1056_v19 = vadd.f32 1e-05, %v1053_v18  ;;  %v1054_v20 = vmax.f32 %v1052_v0, 0.0 }
 0x435   : > { %v1057_v21 = vadd.f32 1e-05, %v1054_v20  ;;  %1790 = vrsqrt.f32 %v1056_v19 }
 0x437   : > { %1792 = vrsqrt.f32 %v1057_v21 }
 0x442   : > { %v1791_v25 = vpop.eup %1790 }
 0x444   : > { %v1793_v27 = vpop.eup %1792 }
 0x445   : > { %v1062_v28 = vcombine.low %v1791_v25, %v1793_v27 }
 0x447   : > { %v1069_v29 = vrot.slane %v1062_v28, %v1068_v26 }
 0x449   : > { %v1076_v31 = vrot.slane %v1069_v29, %v1068_v26 }
 0x44b   : > { %v1078_v33 = vmul.f32 %v1076_v31, %v1055_v30 }
 0x44d   : > { %v1085_v34 = vrot.slane %v1078_v33, %v2236_v45  ;;  %v1089_v35 = vrot.slane %v1078_v33, %v1088_v32 }
 0x44f   : > { %v1092_v36 = vmul.f32 %v1085_v34, %v1031_v7  ;;  %v1093_v37 = vmul.f32 %v1089_v35, %v1032_v13  ;;  %v1114_v46 = vmul.f32 %v1089_v35, %v1014_v47  ;;  %v1113_v49 = vmul.f32 %v1085_v34, %v2266_v42  ;;  %v1492_v47 = vld [vmem:[%s2330_s10] ss:$0 sm:$0xff] }
 0x451   : > { %v1096_v38 = vcombine.low %v1092_v36, %v1093_v37 }
 0x453   : > { %v1103_v39 = vrot.slane %v1096_v38, %v1068_v26 }
 0x455   : > { %v1110_v41 = vrot.slane %v1103_v39, %v1068_v26 }
 0x457   : > { %v1112_v44 = vsub.f32 %v1491_v40, %v1110_v41 }
 0x459   : > { %v1123_v48 = vrot.slane %v1112_v44, %v1088_v32  ;;  %v1119_v43 = vrot.slane %v1112_v44, %v2236_v45 }
 0x45b   : > { %v1127_v50 = vadd.f32 %v1123_v48, %v1114_v46  ;;  %v1126_v51 = vadd.f32 %v1119_v43, %v1113_v49 }
 0x45d   : > { %v1129_v52 = vmax.f32 %v1127_v50, 0.0  ;;  %v1128_v53 = vmax.f32 %v1126_v51, 0.0 }
 0x45f   : > { %v1131_v54 = vpack.c.bf16 %v1129_v52, %v1129_v52  ;;  %v1130_v55 = vpack.c.bf16 %v1128_v53, %v1128_v53 }
 0x461   : > { %1299 = vmatprep.mubr.bf16.mxu0 %v1131_v54 }
 0x462   : > { %1300 = vmatmul.mubr.bf16.vlgmr.msra.gmra.mxu0 %v1130_v55 }
 0x522   : > { %v1556_v56 = vpop.f32.mrf.mxu0 }
 0x524   : > { %v1557_v57 = vpop.f32.mrf.mxu0 }
 0x525   : > { %v1558_v58 = vadd.f32 %v1557_v57, %v1556_v56 }
 0x526   : > { %v1559_v42 = vpop.f32.mrf.mxu0 }
 0x527   : > { %v1302_v59 = vadd.f32 %v1558_v58, %v1492_v47 }
 0x528   : > { %v1560_v45 = vpop.f32.mrf.mxu0 }
 0x529   : > { %v1307_v60 = vmul.f32 0.5, %v1302_v59 }
 0x52b   : > { %1794 = vtanh.f32 %v1307_v60 }
 0x538   : > { %v1795_v61 = vpop.eup %1794 }
 0x539   : > { %v1309_v62 = vmul.f32 0.5, %v1795_v61 }
 0x53b   : > { %v1310_v63 = vadd.f32 0.5, %v1309_v62 }
 0x53d   : > { %1311 = vst [vmem:[%s450_s26] sm:$0xff] %v1310_v63 }
 0x53e   : > { %1939 = shalt.err (!%p1936_p13)
}
 0x53f   : > { %s1940_s25 = scalar_lea.hbm %s1324_s16, 128  ;;  %s1944_s30 = scalar_lea.hbm %s2331_s11, 256 }
 0x540   : > { %p1941_p11 = scmp.ne.s32.totalorder %s1324_s16, %s1940_s25  ;;  %p1945_p3 = scmp.lt.s32.totalorder %s1324_s16, %s2331_s11 }
 0x541   : > { %p1946_p12 = scmp.lt.s32.totalorder %s1944_s30, %s1940_s25 }
 0x542   : > { %p1942_p1 = pnand %p1941_p11, %p2112_p5 }
 0x543   : > { %p1947_p10 = por %p1946_p12, %p1945_p3 }
 0x544   : > { %p1943_p0 = pneg %p1942_p1 }
 0x546   : > { %p1948_p2 = pnand %p1947_p10, %p1943_p0 }
 0x548   : > { %1951 = shalt.err (!%p1948_p2)
}
 0x549   : > { %1642 = dma.vmem_to_hbm [thread:$0]  (%p2112_p5), %s1327_s24, 128, %s1324_s16, %s1313_s23  }
 0x54a PF: > { %s2358_s29 = sld [smem:[#allocation19_spill]]  ;;  %p1674_p6 = scmp.ge.s32.totalorder %s1998_s20, 2 }
 0x54b   : > { %s1338_s13 = sand.u32 1, %s1986_s17  }
 0x54c   : > { %s1339_s19 = scalar_lea.sflag [#allocation4], %s1338_s13 }
 0x550   : > { %p2359_p9 = scmp.ne.s32.totalorder %s2358_s29, 0 }
 0x552   : > { %p1661_p4 = pnand %p1674_p6, %p2359_p9 }
 0x554   : > { %p1662_p7 = pneg %p1661_p4 }
 0x556   : > { %1981 = dma.done.wait (%p1662_p7), %s1339_s19, 128  }
 0x557   : > { %1983 = vsyncadd (%p1662_p7), %s1339_s19, 4294967168  ;;  %s2360_s20 = sld [smem:[#allocation17_spill]]  ;;  %s2363_s17 = smov %s1990_s18 }
 0x558   : > { %s2361_s28 = sld [smem:[#allocation16_spill]] }
 0x559   : > { %s2362_s19 = sld [smem:[#allocation18_spill]] }
 0x55d   : > { %p24_p8 = scmp.ge.s32.totalorder %s2360_s20, 4  }
 0x55e   : > { %s2364_s18 = smov %s2361_s28 }
 0x55f   :  { %26 = sbr.rel (!%p24_p8) target bundleno = 6 (0x6), region = 121 }
 0x564   :  { %1344 = vsyncpa [#allocation3], 1 }
 0x565   :  { %1346 = vsyncpa [#allocation3 + $0x1], 1 }
 0x566   :  { %1347 = vsyncpa [#allocation6], 1 }
 0x567   :  { %1348 = vsyncpa [#allocation9], 1 }
 0x568   :  { %1349 = vsyncpa [#allocation4], 1 }
 0x569   :  { %1351 = vsyncpa [#allocation4 + $0x1], 1 }

</bundles_post_ra>
